<compile_context>
chip_gen: v5e
topology: v5e:2x2
jax: 0.10.0
libtpu: 0.0.40
codegen_flags: <defaults>
</compile_context>

<pallas_src>
import math
from functools import partial

import jax
import jax.numpy as jnp
from jax.experimental import pallas as pl
from jax.experimental.pallas import tpu as pltpu


# Row indices into the packed small-vector array (one bias / LayerNorm vector per 128-lane row).
_BO, _LN1G, _LN1B, _B1, _B2, _LN2G, _LN2B, _B3, _B4 = range(9)
_BQ0 = 9   # rows _BQ0 .. _BQ0 + num_heads - 1 hold the (scaled) per-head q biases


def _gelu_tanh(x):
    # TODO(synk): PyTorch nn.GELU() defaults to the exact erf form; the tanh approximation used
    # here stays on the EUP and differs by <~1e-3.
    c = math.sqrt(2.0 / math.pi)
    return 0.5 * x * (1.0 + jnp.tanh(c * (x + 0.044715 * x * x * x)))


def _layernorm(x, gamma, beta, eps=1e-5):
    mu = jnp.mean(x, axis=-1, keepdims=True)
    xc = x - mu
    var = jnp.mean(xc * xc, axis=-1, keepdims=True)
    return xc * jax.lax.rsqrt(var + eps) * gamma + beta


def _encoder_kernel(x_ref, mask_ref, wq_ref, wkv_ref, wo_ref,
                    w1_ref, w2_ref, w3_ref, w4_ref, vec_ref, o_ref,
                    *, num_heads):
    f32 = jnp.float32
    x = x_ref[...].astype(f32)                       # (M, E), M = BT * L token rows
    M, E = x.shape
    H = num_heads
    hd = E // H

    def vrow(r, n):                                  # packed (1, n) bias / LayerNorm vector
        return vec_ref[r:r + 1, :n]

    # ---- multi-head self-attention -------------------------------------------------------
    # Fused K/V projection, feature-major so per-head slices are aligned sublane slices:
    #   kvT[c, m] = sum_e Wkv[c, e] * x[m, e]        -> (2E, M)
    # Key bias cancels in softmax; value bias was folded into the out-proj bias in the wrapper.
    kvT = jax.lax.dot_general(wkv_ref[...], x, (((1,), (1,)), ((), ())),
                              preferred_element_type=f32)
    mask = mask_ref[...]                             # (M, M) block-diagonal additive mask

    attn = jnp.zeros((M, E), f32)
    for h in range(H):                               # static loop, H is small
        # Per-head Q projection; 1/sqrt(hd) scale and the q bias are pre-folded into wq/vecs.
        qh = jnp.dot(x, wq_ref[h], preferred_element_type=f32) + vrow(_BQ0 + h, hd)   # (M, hd)
        khT = kvT[h * hd:(h + 1) * hd, :]            # (hd, M) sublane slice
        vhT = kvT[E + h * hd:E + (h + 1) * hd, :]    # (hd, M)

        s = jnp.dot(qh, khT, preferred_element_type=f32) + mask                       # (M, M)
        s = s - jnp.max(s, axis=-1, keepdims=True)
        p = jnp.exp(s)
        p = p * pl.reciprocal(jnp.sum(p, axis=-1, keepdims=True), approx=True)
        # TODO(synk): attention-weight dropout (p=0.3) is identity at inference; omitted.
        oh = jax.lax.dot_general(p, vhT, (((1,), (1,)), ((), ())),
                                 preferred_element_type=f32)                          # (M, hd)
        attn = attn + jnp.dot(oh, wo_ref[h], preferred_element_type=f32)              # (M, E)
    attn = attn + vrow(_BO, E)                       # out-proj bias (+ folded value bias)

    # ---- residual + LayerNorm 1 ------------------------------------------------------------
    y = _layernorm(x + attn, vrow(_LN1G, E), vrow(_LN1B, E))

    # ---- feed-forward: Linear -> GELU -> Linear ---------------------------------------------
    Dd = w1_ref.shape[1]
    h1 = _gelu_tanh(jnp.dot(y, w1_ref[...], preferred_element_type=f32) + vrow(_B1, Dd))
    h2 = jnp.dot(h1, w2_ref[...], preferred_element_type=f32) + vrow(_B2, E)

    # ---- LayerNorm 2 (applied directly to the FFN output, per the reference module) ----------
    z = _layernorm(h2, vrow(_LN2G, E), vrow(_LN2B, E))

    # ---- classifier head: Linear(E, 64) -> Dropout(identity) -> Linear(64, Cpad) -------------
    H2 = w3_ref.shape[1]
    z = jnp.dot(z, w3_ref[...], preferred_element_type=f32) + vrow(_B3, H2)
    # TODO(synk): dropout (p=0.2) is identity at inference; omitted.
    Cp = w4_ref.shape[1]
    z = jnp.dot(z, w4_ref[...], preferred_element_type=f32) + vrow(_B4, Cp)

    o_ref[...] = z.astype(o_ref.dtype)


def transformer_encoder(inputs, params, num_heads, *, rows_per_tile=128):
    """inputs: (L, B, E) — PyTorch nn.MultiheadAttention default (seq, batch, embed) layout."""
    L, B, E = inputs.shape
    assert E % num_heads == 0
    hd = E // num_heads
    scale = 1.0 / math.sqrt(hd)
    f32 = jnp.float32

    # ---------------- glue: one-off parameter re-layout (tiny, host/XLA side) ----------------
    ipw, ipb = params["in_proj_weight"], params["in_proj_bias"]        # (3E, E), (3E,)
    wq_rows = ipw[:E]                                                  # (E, E), rows = outputs
    wkv_rows = ipw[E:]                                                 # (2E, E) = [Wk; Wv]
    bq, bv = ipb[:E], ipb[2 * E:]
    wo_t = params["out_proj_weight"].T                                 # (E, E), input-major
    # Key bias cancels in softmax; value bias folds into the out-projection bias.
    bo_eff = params["out_proj_bias"] + bv @ wo_t                       # (E,)

    # Per-head Q weights (input-major, scale folded): (H, E, hd); scaled per-head q biases.
    wq3 = (scale * wq_rows).reshape(num_heads, hd, E).transpose(0, 2, 1)
    bq3 = (scale * bq).reshape(num_heads, hd)
    # Per-head out-projection slices (input-major): (H, hd, E).
    wo3 = wo_t.reshape(num_heads, hd, E)

    Dd = params["w1"].shape[0]
    w1_t = params["w1"].T                                              # (E, Dd)
    w2_t = params["w2"].T                                              # (Dd, E)
    H2 = params["w3"].shape[0]
    w3_t = params["w3"].T                                              # (E, H2)
    C = params["w4"].shape[0]
    Cp = 128 * max(1, -(-C // 128))                                    # lane-dense output width
    w4_t = jnp.zeros((H2, Cp), f32).at[:, :C].set(params["w4"].T)      # (H2, Cp) zero-padded
    b4_p = jnp.zeros((Cp,), f32).at[:C].set(params["b4"])

    # Packed small-vector array: one bias / LayerNorm vector per 128-lane row.
    vw = 128 * max(1, -(-max(E, Dd, H2, Cp, hd) // 128))
    vecs = jnp.zeros((_BQ0 + num_heads, vw), f32)
    for r, v in ((_BO, bo_eff), (_LN1G, params["ln1_gamma"]), (_LN1B, params["ln1_beta"]),
                 (_B1, params["b1"]), (_B2, params["b2"]),
                 (_LN2G, params["ln2_gamma"]), (_LN2B, params["ln2_beta"]),
                 (_B3, params["b3"]), (_B4, b4_p)):
        vecs = vecs.at[r, :v.shape[0]].set(v.astype(f32))
    for h in range(num_heads):
        vecs = vecs.at[_BQ0 + h, :hd].set(bq3[h])

    # ---------------- batch tiling: BT batch elements (M = BT*L rows) per grid step -----------
    bt = max(1, min(B, max(1, rows_per_tile // L)))
    if (bt * L) % 8 != 0:          # keep the row tile sublane-aligned; else use one full tile
        bt = B
    n_tiles = -(-B // bt)
    Bp = n_tiles * bt
    M = bt * L

    x_bm = jnp.transpose(inputs, (1, 0, 2))                            # (B, L, E) batch-major
    if Bp != B:
        x_bm = jnp.concatenate([x_bm, jnp.zeros((Bp - B, L, E), inputs.dtype)], axis=0)
    x_rows = x_bm.reshape(Bp * L, E)                                   # token-major rows

    # Block-diagonal additive mask so batch elements inside one row tile don't attend across.
    blk = jnp.arange(M, dtype=jnp.int32) // L
    mask = jnp.where(blk[:, None] == blk[None, :], 0.0, -1e30).astype(f32)

    weights = (mask, wq3, wkv_rows, wo3, w1_t, w2_t, w3_t, w4_t, vecs)

    def resident(arr):
        # Constant index_map -> the block is fetched once and stays resident in VMEM.
        nd = arr.ndim
        return pl.BlockSpec(arr.shape, lambda i, _nd=nd: (0,) * _nd)

    out_rows = pl.pallas_call(
        partial(_encoder_kernel, num_heads=num_heads),
        out_shape=jax.ShapeDtypeStruct((Bp * L, Cp), inputs.dtype),
        grid_spec=pltpu.PrefetchScalarGridSpec(
            num_scalar_prefetch=0,
            grid=(n_tiles,),
            in_specs=[pl.BlockSpec((M, E), lambda i: (i, 0))]
                     + [resident(w) for w in weights],
            out_specs=pl.BlockSpec((M, Cp), lambda i: (i, 0)),
        ),
        compiler_params=pltpu.CompilerParams(
            # Row tiles are independent -> megacore-shardable on multi-TensorCore parts.
            dimension_semantics=("parallel",),
        ),
    )(x_rows, *weights)

    out = out_rows.reshape(Bp, L, Cp)[:B, :, :C]                       # strip batch/class padding
    return jnp.transpose(out, (1, 0, 2))                               # (L, B, C)


def _reference(x, params, num_heads):
    """Plain-JAX reference (same math, same GELU approximation)."""
    L, B, E = x.shape
    hd = E // num_heads
    ipw, ipb = params["in_proj_weight"], params["in_proj_bias"]
    wq, wk, wv = ipw[:E], ipw[E:2 * E], ipw[2 * E:]
    bq, bk, bv = ipb[:E], ipb[E:2 * E], ipb[2 * E:]
    q = x @ wq.T + bq
    k = x @ wk.T + bk
    v = x @ wv.T + bv

    def heads(t):                                   # (L,B,E) -> (B,H,L,hd)
        return t.reshape(L, B, num_heads, hd).transpose(1, 2, 0, 3)

    qh, kh, vh = heads(q) * (1.0 / math.sqrt(hd)), heads(k), heads(v)
    s = jnp.einsum("bhqd,bhkd->bhqk", qh, kh)
    s = s - jnp.max(s, axis=-1, keepdims=True)
    p = jnp.exp(s)
    p = p / jnp.sum(p, axis=-1, keepdims=True)
    o = jnp.einsum("bhqk,bhkd->bhqd", p, vh)        # (B,H,L,hd)
    o = o.transpose(2, 0, 1, 3).reshape(L, B, E)
    attn = o @ params["out_proj_weight"].T + params["out_proj_bias"]

    y = _layernorm(x + attn, params["ln1_gamma"], params["ln1_beta"])
    h = _gelu_tanh(y @ params["w1"].T + params["b1"])
    h = h @ params["w2"].T + params["b2"]
    z = _layernorm(h, params["ln2_gamma"], params["ln2_beta"])
    z = z @ params["w3"].T + params["b3"]
    z = z @ params["w4"].T + params["b4"]
    return z


if __name__ == "__main__":
    embed_dim, num_heads, dense_dim, num_classes = 32, 4, 64, 10
    L, B = 8, 2

    key = jax.random.PRNGKey(0)
    keys = jax.random.split(key, 16)

    def normal(k, shape, scale=0.1):
        return scale * jax.random.normal(k, shape, dtype=jnp.float32)

    params = {
        "in_proj_weight": normal(keys[0], (3 * embed_dim, embed_dim)),
        "in_proj_bias": normal(keys[1], (3 * embed_dim,)),
        "out_proj_weight": normal(keys[2], (embed_dim, embed_dim)),
        "out_proj_bias": normal(keys[3], (embed_dim,)),
        "ln1_gamma": jnp.ones((embed_dim,), jnp.float32),
        "ln1_beta": jnp.zeros((embed_dim,), jnp.float32),
        "w1": normal(keys[4], (dense_dim, embed_dim)),
        "b1": normal(keys[5], (dense_dim,)),
        "w2": normal(keys[6], (embed_dim, dense_dim)),
        "b2": normal(keys[7], (embed_dim,)),
        "ln2_gamma": jnp.ones((embed_dim,), jnp.float32),
        "ln2_beta": jnp.zeros((embed_dim,), jnp.float32),
        "w3": normal(keys[8], (64, embed_dim)),
        "b3": normal(keys[9], (64,)),
        "w4": normal(keys[10], (num_classes, 64)),
        "b4": normal(keys[11], (num_classes,)),
    }

    # Small sanity-check shape (single tile).
    x = jax.random.normal(keys[12], (L, B, embed_dim), dtype=jnp.float32)
    out = jax.block_until_ready(transformer_encoder(x, params, num_heads))
    assert out.shape == (L, B, num_classes)
    ref = _reference(x, params, num_heads)
    max_err = float(jnp.max(jnp.abs(out - ref)))
    assert jnp.allclose(out, ref, atol=1e-2, rtol=1e-2), f"mismatch vs reference: {max_err}"

    # Larger batch to exercise the multi-tile (M=128 rows/step) path with batch padding.
    x2 = jax.random.normal(keys[13], (L, 20, embed_dim), dtype=jnp.float32)
    out2 = jax.block_until_ready(transformer_encoder(x2, params, num_heads))
    ref2 = _reference(x2, params, num_heads)
    max_err2 = float(jnp.max(jnp.abs(out2 - ref2)))
    assert jnp.allclose(out2, ref2, atol=1e-2, rtol=1e-2), f"mismatch vs reference: {max_err2}"

    print("KERNEL_OK")
</pallas_src>

<mosaic_0001>
module attributes {stable_mosaic.version = 11 : i64} {
  func.func @_encoder_kernel(%arg0: i32, %arg1: memref<16x32xf32, #tpu.memory_space<vmem>>, %arg2: memref<16x16xf32, #tpu.memory_space<vmem>>, %arg3: memref<4x32x8xf32, #tpu.memory_space<vmem>>, %arg4: memref<64x32xf32, #tpu.memory_space<vmem>>, %arg5: memref<4x8x32xf32, #tpu.memory_space<vmem>>, %arg6: memref<32x64xf32, #tpu.memory_space<vmem>>, %arg7: memref<64x32xf32, #tpu.memory_space<vmem>>, %arg8: memref<32x64xf32, #tpu.memory_space<vmem>>, %arg9: memref<64x128xf32, #tpu.memory_space<vmem>>, %arg10: memref<13x128xf32, #tpu.memory_space<vmem>>, %arg11: memref<16x128xf32, #tpu.memory_space<vmem>>) attributes {dimension_semantics = [#tpu.dimension_semantics<parallel>], iteration_bounds = array<i64: 1>, scalar_prefetch = 0 : i64, scratch_operands = 0 : i64, tpu.core_type = #tpu.core_type<tc>, window_params = [{transform_indices = @transform_0, window_bounds = array<i64: 16, 32>}, {pipeline_mode = #tpu.pipeline_mode<synchronous>, transform_indices = @transform_1, window_bounds = array<i64: 16, 16>}, {pipeline_mode = #tpu.pipeline_mode<synchronous>, transform_indices = @transform_2, window_bounds = array<i64: 4, 32, 8>}, {pipeline_mode = #tpu.pipeline_mode<synchronous>, transform_indices = @transform_3, window_bounds = array<i64: 64, 32>}, {pipeline_mode = #tpu.pipeline_mode<synchronous>, transform_indices = @transform_4, window_bounds = array<i64: 4, 8, 32>}, {pipeline_mode = #tpu.pipeline_mode<synchronous>, transform_indices = @transform_5, window_bounds = array<i64: 32, 64>}, {pipeline_mode = #tpu.pipeline_mode<synchronous>, transform_indices = @transform_6, window_bounds = array<i64: 64, 32>}, {pipeline_mode = #tpu.pipeline_mode<synchronous>, transform_indices = @transform_7, window_bounds = array<i64: 32, 64>}, {pipeline_mode = #tpu.pipeline_mode<synchronous>, transform_indices = @transform_8, window_bounds = array<i64: 64, 128>}, {pipeline_mode = #tpu.pipeline_mode<synchronous>, transform_indices = @transform_9, window_bounds = array<i64: 13, 128>}, {transform_indices = @transform_10, window_bounds = array<i64: 16, 128>}]} {
    %c0 = arith.constant 0 : index
    %c0_0 = arith.constant 0 : index
    %0 = vector.load %arg1[%c0, %c0_0] : memref<16x32xf32, #tpu.memory_space<vmem>>, vector<16x32xf32>
    %c0_1 = arith.constant 0 : index
    %c0_2 = arith.constant 0 : index
    %1 = vector.load %arg4[%c0_1, %c0_2] : memref<64x32xf32, #tpu.memory_space<vmem>>, vector<64x32xf32>
    %cst = arith.constant dense<0.000000e+00> : vector<64x16xf32>
    %2 = tpu.matmul %1, %0, %cst {dimension_numbers = #tpu.dot_dimension_numbers<[1], [1], [0], [0], [0, 0, 1, 0], [], []>} : vector<64x32xf32>, vector<16x32xf32>, vector<64x16xf32> -> vector<64x16xf32>
    %c0_3 = arith.constant 0 : index
    %c0_4 = arith.constant 0 : index
    %3 = vector.load %arg2[%c0_3, %c0_4] : memref<16x16xf32, #tpu.memory_space<vmem>>, vector<16x16xf32>
    %cst_5 = arith.constant 0.000000e+00 : f32
    %4 = vector.broadcast %cst_5 : f32 to vector<16x32xf32>
    %c0_6 = arith.constant 0 : index
    %c0_7 = arith.constant 0 : index
    %c0_8 = arith.constant 0 : index
    %5 = vector.load %arg3[%c0_6, %c0_7, %c0_8] : memref<4x32x8xf32, #tpu.memory_space<vmem>>, vector<1x32x8xf32>
    %6 = vector.shape_cast %5 : vector<1x32x8xf32> to vector<32x8xf32>
    %cst_9 = arith.constant dense<0.000000e+00> : vector<16x8xf32>
    %7 = tpu.matmul %0, %6, %cst_9 {dimension_numbers = #tpu.dot_dimension_numbers<[1], [0], [0], [1], [0, 0, 1, 1], [], []>} : vector<16x32xf32>, vector<32x8xf32>, vector<16x8xf32> -> vector<16x8xf32>
    %c9 = arith.constant 9 : index
    %c0_10 = arith.constant 0 : index
    %8 = vector.load %arg10[%c9, %c0_10] : memref<13x128xf32, #tpu.memory_space<vmem>>, vector<1x8xf32>
    %9 = vector.broadcast %8 : vector<1x8xf32> to vector<16x8xf32>
    %10 = arith.addf %7, %9 : vector<16x8xf32>
    %11 = vector.extract_strided_slice %2 {offsets = [0, 0], sizes = [8, 16], strides = [1, 1]} : vector<64x16xf32> to vector<8x16xf32>
    %12 = vector.extract_strided_slice %2 {offsets = [32, 0], sizes = [8, 16], strides = [1, 1]} : vector<64x16xf32> to vector<8x16xf32>
    %cst_11 = arith.constant dense<0.000000e+00> : vector<16x16xf32>
    %13 = tpu.matmul %10, %11, %cst_11 {dimension_numbers = #tpu.dot_dimension_numbers<[1], [0], [0], [1], [0, 0, 1, 1], [], []>} : vector<16x8xf32>, vector<8x16xf32>, vector<16x16xf32> -> vector<16x16xf32>
    %14 = arith.addf %13, %3 : vector<16x16xf32>
    %cst_12 = arith.constant dense<0xFF800000> : vector<16xf32>
    %15 = vector.multi_reduction <maximumf>, %14, %cst_12 [1] : vector<16x16xf32> to vector<16xf32>
    %16 = vector.shape_cast %15 : vector<16xf32> to vector<16x1xf32>
    %17 = vector.broadcast %16 : vector<16x1xf32> to vector<16x16xf32>
    %18 = arith.subf %14, %17 : vector<16x16xf32>
    %19 = math.exp %18 : vector<16x16xf32>
    %cst_13 = arith.constant dense<0.000000e+00> : vector<16xf32>
    %20 = vector.multi_reduction <add>, %19, %cst_13 [1] : vector<16x16xf32> to vector<16xf32>
    %21 = vector.shape_cast %20 : vector<16xf32> to vector<16x1xf32>
    %22 = tpu.reciprocal %21 {approx = true} : vector<16x1xf32> -> vector<16x1xf32>
    %23 = vector.broadcast %22 : vector<16x1xf32> to vector<16x16xf32>
    %24 = arith.mulf %19, %23 : vector<16x16xf32>
    %cst_14 = arith.constant dense<0.000000e+00> : vector<16x8xf32>
    %25 = tpu.matmul %24, %12, %cst_14 {dimension_numbers = #tpu.dot_dimension_numbers<[1], [1], [0], [0], [0, 0, 1, 0], [], []>} : vector<16x16xf32>, vector<8x16xf32>, vector<16x8xf32> -> vector<16x8xf32>
    %c0_15 = arith.constant 0 : index
    %c0_16 = arith.constant 0 : index
    %c0_17 = arith.constant 0 : index
    %26 = vector.load %arg5[%c0_15, %c0_16, %c0_17] : memref<4x8x32xf32, #tpu.memory_space<vmem>>, vector<1x8x32xf32>
    %27 = vector.shape_cast %26 : vector<1x8x32xf32> to vector<8x32xf32>
    %cst_18 = arith.constant dense<0.000000e+00> : vector<16x32xf32>
    %28 = tpu.matmul %25, %27, %cst_18 {dimension_numbers = #tpu.dot_dimension_numbers<[1], [0], [0], [1], [0, 0, 1, 1], [], []>} : vector<16x8xf32>, vector<8x32xf32>, vector<16x32xf32> -> vector<16x32xf32>
    %29 = arith.addf %4, %28 : vector<16x32xf32>
    %c1 = arith.constant 1 : index
    %c0_19 = arith.constant 0 : index
    %c0_20 = arith.constant 0 : index
    %30 = vector.load %arg3[%c1, %c0_19, %c0_20] : memref<4x32x8xf32, #tpu.memory_space<vmem>>, vector<1x32x8xf32>
    %31 = vector.shape_cast %30 : vector<1x32x8xf32> to vector<32x8xf32>
    %cst_21 = arith.constant dense<0.000000e+00> : vector<16x8xf32>
    %32 = tpu.matmul %0, %31, %cst_21 {dimension_numbers = #tpu.dot_dimension_numbers<[1], [0], [0], [1], [0, 0, 1, 1], [], []>} : vector<16x32xf32>, vector<32x8xf32>, vector<16x8xf32> -> vector<16x8xf32>
    %c10 = arith.constant 10 : index
    %c0_22 = arith.constant 0 : index
    %33 = vector.load %arg10[%c10, %c0_22] : memref<13x128xf32, #tpu.memory_space<vmem>>, vector<1x8xf32>
    %34 = vector.broadcast %33 : vector<1x8xf32> to vector<16x8xf32>
    %35 = arith.addf %32, %34 : vector<16x8xf32>
    %36 = vector.extract_strided_slice %2 {offsets = [8, 0], sizes = [8, 16], strides = [1, 1]} : vector<64x16xf32> to vector<8x16xf32>
    %37 = vector.extract_strided_slice %2 {offsets = [40, 0], sizes = [8, 16], strides = [1, 1]} : vector<64x16xf32> to vector<8x16xf32>
    %cst_23 = arith.constant dense<0.000000e+00> : vector<16x16xf32>
    %38 = tpu.matmul %35, %36, %cst_23 {dimension_numbers = #tpu.dot_dimension_numbers<[1], [0], [0], [1], [0, 0, 1, 1], [], []>} : vector<16x8xf32>, vector<8x16xf32>, vector<16x16xf32> -> vector<16x16xf32>
    %39 = arith.addf %38, %3 : vector<16x16xf32>
    %cst_24 = arith.constant dense<0xFF800000> : vector<16xf32>
    %40 = vector.multi_reduction <maximumf>, %39, %cst_24 [1] : vector<16x16xf32> to vector<16xf32>
    %41 = vector.shape_cast %40 : vector<16xf32> to vector<16x1xf32>
    %42 = vector.broadcast %41 : vector<16x1xf32> to vector<16x16xf32>
    %43 = arith.subf %39, %42 : vector<16x16xf32>
    %44 = math.exp %43 : vector<16x16xf32>
    %cst_25 = arith.constant dense<0.000000e+00> : vector<16xf32>
    %45 = vector.multi_reduction <add>, %44, %cst_25 [1] : vector<16x16xf32> to vector<16xf32>
    %46 = vector.shape_cast %45 : vector<16xf32> to vector<16x1xf32>
    %47 = tpu.reciprocal %46 {approx = true} : vector<16x1xf32> -> vector<16x1xf32>
    %48 = vector.broadcast %47 : vector<16x1xf32> to vector<16x16xf32>
    %49 = arith.mulf %44, %48 : vector<16x16xf32>
    %cst_26 = arith.constant dense<0.000000e+00> : vector<16x8xf32>
    %50 = tpu.matmul %49, %37, %cst_26 {dimension_numbers = #tpu.dot_dimension_numbers<[1], [1], [0], [0], [0, 0, 1, 0], [], []>} : vector<16x16xf32>, vector<8x16xf32>, vector<16x8xf32> -> vector<16x8xf32>
    %c1_27 = arith.constant 1 : index
    %c0_28 = arith.constant 0 : index
    %c0_29 = arith.constant 0 : index
    %51 = vector.load %arg5[%c1_27, %c0_28, %c0_29] : memref<4x8x32xf32, #tpu.memory_space<vmem>>, vector<1x8x32xf32>
    %52 = vector.shape_cast %51 : vector<1x8x32xf32> to vector<8x32xf32>
    %cst_30 = arith.constant dense<0.000000e+00> : vector<16x32xf32>
    %53 = tpu.matmul %50, %52, %cst_30 {dimension_numbers = #tpu.dot_dimension_numbers<[1], [0], [0], [1], [0, 0, 1, 1], [], []>} : vector<16x8xf32>, vector<8x32xf32>, vector<16x32xf32> -> vector<16x32xf32>
    %54 = arith.addf %29, %53 : vector<16x32xf32>
    %c2 = arith.constant 2 : index
    %c0_31 = arith.constant 0 : index
    %c0_32 = arith.constant 0 : index
    %55 = vector.load %arg3[%c2, %c0_31, %c0_32] : memref<4x32x8xf32, #tpu.memory_space<vmem>>, vector<1x32x8xf32>
    %56 = vector.shape_cast %55 : vector<1x32x8xf32> to vector<32x8xf32>
    %cst_33 = arith.constant dense<0.000000e+00> : vector<16x8xf32>
    %57 = tpu.matmul %0, %56, %cst_33 {dimension_numbers = #tpu.dot_dimension_numbers<[1], [0], [0], [1], [0, 0, 1, 1], [], []>} : vector<16x32xf32>, vector<32x8xf32>, vector<16x8xf32> -> vector<16x8xf32>
    %c11 = arith.constant 11 : index
    %c0_34 = arith.constant 0 : index
    %58 = vector.load %arg10[%c11, %c0_34] : memref<13x128xf32, #tpu.memory_space<vmem>>, vector<1x8xf32>
    %59 = vector.broadcast %58 : vector<1x8xf32> to vector<16x8xf32>
    %60 = arith.addf %57, %59 : vector<16x8xf32>
    %61 = vector.extract_strided_slice %2 {offsets = [16, 0], sizes = [8, 16], strides = [1, 1]} : vector<64x16xf32> to vector<8x16xf32>
    %62 = vector.extract_strided_slice %2 {offsets = [48, 0], sizes = [8, 16], strides = [1, 1]} : vector<64x16xf32> to vector<8x16xf32>
    %cst_35 = arith.constant dense<0.000000e+00> : vector<16x16xf32>
    %63 = tpu.matmul %60, %61, %cst_35 {dimension_numbers = #tpu.dot_dimension_numbers<[1], [0], [0], [1], [0, 0, 1, 1], [], []>} : vector<16x8xf32>, vector<8x16xf32>, vector<16x16xf32> -> vector<16x16xf32>
    %64 = arith.addf %63, %3 : vector<16x16xf32>
    %cst_36 = arith.constant dense<0xFF800000> : vector<16xf32>
    %65 = vector.multi_reduction <maximumf>, %64, %cst_36 [1] : vector<16x16xf32> to vector<16xf32>
    %66 = vector.shape_cast %65 : vector<16xf32> to vector<16x1xf32>
    %67 = vector.broadcast %66 : vector<16x1xf32> to vector<16x16xf32>
    %68 = arith.subf %64, %67 : vector<16x16xf32>
    %69 = math.exp %68 : vector<16x16xf32>
    %cst_37 = arith.constant dense<0.000000e+00> : vector<16xf32>
    %70 = vector.multi_reduction <add>, %69, %cst_37 [1] : vector<16x16xf32> to vector<16xf32>
    %71 = vector.shape_cast %70 : vector<16xf32> to vector<16x1xf32>
    %72 = tpu.reciprocal %71 {approx = true} : vector<16x1xf32> -> vector<16x1xf32>
    %73 = vector.broadcast %72 : vector<16x1xf32> to vector<16x16xf32>
    %74 = arith.mulf %69, %73 : vector<16x16xf32>
    %cst_38 = arith.constant dense<0.000000e+00> : vector<16x8xf32>
    %75 = tpu.matmul %74, %62, %cst_38 {dimension_numbers = #tpu.dot_dimension_numbers<[1], [1], [0], [0], [0, 0, 1, 0], [], []>} : vector<16x16xf32>, vector<8x16xf32>, vector<16x8xf32> -> vector<16x8xf32>
    %c2_39 = arith.constant 2 : index
    %c0_40 = arith.constant 0 : index
    %c0_41 = arith.constant 0 : index
    %76 = vector.load %arg5[%c2_39, %c0_40, %c0_41] : memref<4x8x32xf32, #tpu.memory_space<vmem>>, vector<1x8x32xf32>
    %77 = vector.shape_cast %76 : vector<1x8x32xf32> to vector<8x32xf32>
    %cst_42 = arith.constant dense<0.000000e+00> : vector<16x32xf32>
    %78 = tpu.matmul %75, %77, %cst_42 {dimension_numbers = #tpu.dot_dimension_numbers<[1], [0], [0], [1], [0, 0, 1, 1], [], []>} : vector<16x8xf32>, vector<8x32xf32>, vector<16x32xf32> -> vector<16x32xf32>
    %79 = arith.addf %54, %78 : vector<16x32xf32>
    %c3 = arith.constant 3 : index
    %c0_43 = arith.constant 0 : index
    %c0_44 = arith.constant 0 : index
    %80 = vector.load %arg3[%c3, %c0_43, %c0_44] : memref<4x32x8xf32, #tpu.memory_space<vmem>>, vector<1x32x8xf32>
    %81 = vector.shape_cast %80 : vector<1x32x8xf32> to vector<32x8xf32>
    %cst_45 = arith.constant dense<0.000000e+00> : vector<16x8xf32>
    %82 = tpu.matmul %0, %81, %cst_45 {dimension_numbers = #tpu.dot_dimension_numbers<[1], [0], [0], [1], [0, 0, 1, 1], [], []>} : vector<16x32xf32>, vector<32x8xf32>, vector<16x8xf32> -> vector<16x8xf32>
    %c12 = arith.constant 12 : index
    %c0_46 = arith.constant 0 : index
    %83 = vector.load %arg10[%c12, %c0_46] : memref<13x128xf32, #tpu.memory_space<vmem>>, vector<1x8xf32>
    %84 = vector.broadcast %83 : vector<1x8xf32> to vector<16x8xf32>
    %85 = arith.addf %82, %84 : vector<16x8xf32>
    %86 = vector.extract_strided_slice %2 {offsets = [24, 0], sizes = [8, 16], strides = [1, 1]} : vector<64x16xf32> to vector<8x16xf32>
    %87 = vector.extract_strided_slice %2 {offsets = [56, 0], sizes = [8, 16], strides = [1, 1]} : vector<64x16xf32> to vector<8x16xf32>
    %cst_47 = arith.constant dense<0.000000e+00> : vector<16x16xf32>
    %88 = tpu.matmul %85, %86, %cst_47 {dimension_numbers = #tpu.dot_dimension_numbers<[1], [0], [0], [1], [0, 0, 1, 1], [], []>} : vector<16x8xf32>, vector<8x16xf32>, vector<16x16xf32> -> vector<16x16xf32>
    %89 = arith.addf %88, %3 : vector<16x16xf32>
    %cst_48 = arith.constant dense<0xFF800000> : vector<16xf32>
    %90 = vector.multi_reduction <maximumf>, %89, %cst_48 [1] : vector<16x16xf32> to vector<16xf32>
    %91 = vector.shape_cast %90 : vector<16xf32> to vector<16x1xf32>
    %92 = vector.broadcast %91 : vector<16x1xf32> to vector<16x16xf32>
    %93 = arith.subf %89, %92 : vector<16x16xf32>
    %94 = math.exp %93 : vector<16x16xf32>
    %cst_49 = arith.constant dense<0.000000e+00> : vector<16xf32>
    %95 = vector.multi_reduction <add>, %94, %cst_49 [1] : vector<16x16xf32> to vector<16xf32>
    %96 = vector.shape_cast %95 : vector<16xf32> to vector<16x1xf32>
    %97 = tpu.reciprocal %96 {approx = true} : vector<16x1xf32> -> vector<16x1xf32>
    %98 = vector.broadcast %97 : vector<16x1xf32> to vector<16x16xf32>
    %99 = arith.mulf %94, %98 : vector<16x16xf32>
    %cst_50 = arith.constant dense<0.000000e+00> : vector<16x8xf32>
    %100 = tpu.matmul %99, %87, %cst_50 {dimension_numbers = #tpu.dot_dimension_numbers<[1], [1], [0], [0], [0, 0, 1, 0], [], []>} : vector<16x16xf32>, vector<8x16xf32>, vector<16x8xf32> -> vector<16x8xf32>
    %c3_51 = arith.constant 3 : index
    %c0_52 = arith.constant 0 : index
    %c0_53 = arith.constant 0 : index
    %101 = vector.load %arg5[%c3_51, %c0_52, %c0_53] : memref<4x8x32xf32, #tpu.memory_space<vmem>>, vector<1x8x32xf32>
    %102 = vector.shape_cast %101 : vector<1x8x32xf32> to vector<8x32xf32>
    %cst_54 = arith.constant dense<0.000000e+00> : vector<16x32xf32>
    %103 = tpu.matmul %100, %102, %cst_54 {dimension_numbers = #tpu.dot_dimension_numbers<[1], [0], [0], [1], [0, 0, 1, 1], [], []>} : vector<16x8xf32>, vector<8x32xf32>, vector<16x32xf32> -> vector<16x32xf32>
    %104 = arith.addf %79, %103 : vector<16x32xf32>
    %c0_55 = arith.constant 0 : index
    %c0_56 = arith.constant 0 : index
    %105 = vector.load %arg10[%c0_55, %c0_56] : memref<13x128xf32, #tpu.memory_space<vmem>>, vector<1x32xf32>
    %106 = vector.broadcast %105 : vector<1x32xf32> to vector<16x32xf32>
    %107 = arith.addf %104, %106 : vector<16x32xf32>
    %108 = arith.addf %0, %107 : vector<16x32xf32>
    %c1_57 = arith.constant 1 : index
    %c0_58 = arith.constant 0 : index
    %109 = vector.load %arg10[%c1_57, %c0_58] : memref<13x128xf32, #tpu.memory_space<vmem>>, vector<1x32xf32>
    %c2_59 = arith.constant 2 : index
    %c0_60 = arith.constant 0 : index
    %110 = vector.load %arg10[%c2_59, %c0_60] : memref<13x128xf32, #tpu.memory_space<vmem>>, vector<1x32xf32>
    %cst_61 = arith.constant dense<0.000000e+00> : vector<16xf32>
    %111 = vector.multi_reduction <add>, %108, %cst_61 [1] : vector<16x32xf32> to vector<16xf32>
    %112 = vector.shape_cast %111 : vector<16xf32> to vector<16x1xf32>
    %cst_62 = arith.constant 3.200000e+01 : f32
    %113 = vector.broadcast %cst_62 : f32 to vector<16x1xf32>
    %114 = arith.divf %112, %113 : vector<16x1xf32>
    %115 = vector.broadcast %114 : vector<16x1xf32> to vector<16x32xf32>
    %116 = arith.subf %108, %115 : vector<16x32xf32>
    %117 = arith.mulf %116, %116 : vector<16x32xf32>
    %cst_63 = arith.constant dense<0.000000e+00> : vector<16xf32>
    %118 = vector.multi_reduction <add>, %117, %cst_63 [1] : vector<16x32xf32> to vector<16xf32>
    %119 = vector.shape_cast %118 : vector<16xf32> to vector<16x1xf32>
    %cst_64 = arith.constant 3.200000e+01 : f32
    %120 = vector.broadcast %cst_64 : f32 to vector<16x1xf32>
    %121 = arith.divf %119, %120 : vector<16x1xf32>
    %cst_65 = arith.constant 9.99999974E-6 : f32
    %122 = vector.broadcast %cst_65 : f32 to vector<16x1xf32>
    %123 = arith.addf %121, %122 : vector<16x1xf32>
    %124 = math.rsqrt %123 : vector<16x1xf32>
    %125 = vector.broadcast %124 : vector<16x1xf32> to vector<16x32xf32>
    %126 = arith.mulf %116, %125 : vector<16x32xf32>
    %127 = vector.broadcast %109 : vector<1x32xf32> to vector<16x32xf32>
    %128 = arith.mulf %126, %127 : vector<16x32xf32>
    %129 = vector.broadcast %110 : vector<1x32xf32> to vector<16x32xf32>
    %130 = arith.addf %128, %129 : vector<16x32xf32>
    %c0_66 = arith.constant 0 : index
    %c0_67 = arith.constant 0 : index
    %131 = vector.load %arg6[%c0_66, %c0_67] : memref<32x64xf32, #tpu.memory_space<vmem>>, vector<32x64xf32>
    %cst_68 = arith.constant dense<0.000000e+00> : vector<16x64xf32>
    %132 = tpu.matmul %130, %131, %cst_68 {dimension_numbers = #tpu.dot_dimension_numbers<[1], [0], [0], [1], [0, 0, 1, 1], [], []>} : vector<16x32xf32>, vector<32x64xf32>, vector<16x64xf32> -> vector<16x64xf32>
    %c3_69 = arith.constant 3 : index
    %c0_70 = arith.constant 0 : index
    %133 = vector.load %arg10[%c3_69, %c0_70] : memref<13x128xf32, #tpu.memory_space<vmem>>, vector<1x64xf32>
    %134 = vector.broadcast %133 : vector<1x64xf32> to vector<16x64xf32>
    %135 = arith.addf %132, %134 : vector<16x64xf32>
    %cst_71 = arith.constant 5.000000e-01 : f32
    %136 = vector.broadcast %cst_71 : f32 to vector<16x64xf32>
    %137 = arith.mulf %136, %135 : vector<16x64xf32>
    %cst_72 = arith.constant 4.471500e-02 : f32
    %138 = vector.broadcast %cst_72 : f32 to vector<16x64xf32>
    %139 = arith.mulf %138, %135 : vector<16x64xf32>
    %140 = arith.mulf %139, %135 : vector<16x64xf32>
    %141 = arith.mulf %140, %135 : vector<16x64xf32>
    %142 = arith.addf %135, %141 : vector<16x64xf32>
    %cst_73 = arith.constant 0.797884583 : f32
    %143 = vector.broadcast %cst_73 : f32 to vector<16x64xf32>
    %144 = arith.mulf %143, %142 : vector<16x64xf32>
    %145 = math.tanh %144 : vector<16x64xf32>
    %cst_74 = arith.constant 1.000000e+00 : f32
    %146 = vector.broadcast %cst_74 : f32 to vector<16x64xf32>
    %147 = arith.addf %146, %145 : vector<16x64xf32>
    %148 = arith.mulf %137, %147 : vector<16x64xf32>
    %c0_75 = arith.constant 0 : index
    %c0_76 = arith.constant 0 : index
    %149 = vector.load %arg7[%c0_75, %c0_76] : memref<64x32xf32, #tpu.memory_space<vmem>>, vector<64x32xf32>
    %cst_77 = arith.constant dense<0.000000e+00> : vector<16x32xf32>
    %150 = tpu.matmul %148, %149, %cst_77 {dimension_numbers = #tpu.dot_dimension_numbers<[1], [0], [0], [1], [0, 0, 1, 1], [], []>} : vector<16x64xf32>, vector<64x32xf32>, vector<16x32xf32> -> vector<16x32xf32>
    %c4 = arith.constant 4 : index
    %c0_78 = arith.constant 0 : index
    %151 = vector.load %arg10[%c4, %c0_78] : memref<13x128xf32, #tpu.memory_space<vmem>>, vector<1x32xf32>
    %152 = vector.broadcast %151 : vector<1x32xf32> to vector<16x32xf32>
    %153 = arith.addf %150, %152 : vector<16x32xf32>
    %c5 = arith.constant 5 : index
    %c0_79 = arith.constant 0 : index
    %154 = vector.load %arg10[%c5, %c0_79] : memref<13x128xf32, #tpu.memory_space<vmem>>, vector<1x32xf32>
    %c6 = arith.constant 6 : index
    %c0_80 = arith.constant 0 : index
    %155 = vector.load %arg10[%c6, %c0_80] : memref<13x128xf32, #tpu.memory_space<vmem>>, vector<1x32xf32>
    %cst_81 = arith.constant dense<0.000000e+00> : vector<16xf32>
    %156 = vector.multi_reduction <add>, %153, %cst_81 [1] : vector<16x32xf32> to vector<16xf32>
    %157 = vector.shape_cast %156 : vector<16xf32> to vector<16x1xf32>
    %cst_82 = arith.constant 3.200000e+01 : f32
    %158 = vector.broadcast %cst_82 : f32 to vector<16x1xf32>
    %159 = arith.divf %157, %158 : vector<16x1xf32>
    %160 = vector.broadcast %159 : vector<16x1xf32> to vector<16x32xf32>
    %161 = arith.subf %153, %160 : vector<16x32xf32>
    %162 = arith.mulf %161, %161 : vector<16x32xf32>
    %cst_83 = arith.constant dense<0.000000e+00> : vector<16xf32>
    %163 = vector.multi_reduction <add>, %162, %cst_83 [1] : vector<16x32xf32> to vector<16xf32>
    %164 = vector.shape_cast %163 : vector<16xf32> to vector<16x1xf32>
    %cst_84 = arith.constant 3.200000e+01 : f32
    %165 = vector.broadcast %cst_84 : f32 to vector<16x1xf32>
    %166 = arith.divf %164, %165 : vector<16x1xf32>
    %cst_85 = arith.constant 9.99999974E-6 : f32
    %167 = vector.broadcast %cst_85 : f32 to vector<16x1xf32>
    %168 = arith.addf %166, %167 : vector<16x1xf32>
    %169 = math.rsqrt %168 : vector<16x1xf32>
    %170 = vector.broadcast %169 : vector<16x1xf32> to vector<16x32xf32>
    %171 = arith.mulf %161, %170 : vector<16x32xf32>
    %172 = vector.broadcast %154 : vector<1x32xf32> to vector<16x32xf32>
    %173 = arith.mulf %171, %172 : vector<16x32xf32>
    %174 = vector.broadcast %155 : vector<1x32xf32> to vector<16x32xf32>
    %175 = arith.addf %173, %174 : vector<16x32xf32>
    %c0_86 = arith.constant 0 : index
    %c0_87 = arith.constant 0 : index
    %176 = vector.load %arg8[%c0_86, %c0_87] : memref<32x64xf32, #tpu.memory_space<vmem>>, vector<32x64xf32>
    %cst_88 = arith.constant dense<0.000000e+00> : vector<16x64xf32>
    %177 = tpu.matmul %175, %176, %cst_88 {dimension_numbers = #tpu.dot_dimension_numbers<[1], [0], [0], [1], [0, 0, 1, 1], [], []>} : vector<16x32xf32>, vector<32x64xf32>, vector<16x64xf32> -> vector<16x64xf32>
    %c7 = arith.constant 7 : index
    %c0_89 = arith.constant 0 : index
    %178 = vector.load %arg10[%c7, %c0_89] : memref<13x128xf32, #tpu.memory_space<vmem>>, vector<1x64xf32>
    %179 = vector.broadcast %178 : vector<1x64xf32> to vector<16x64xf32>
    %180 = arith.addf %177, %179 : vector<16x64xf32>
    %c0_90 = arith.constant 0 : index
    %c0_91 = arith.constant 0 : index
    %181 = vector.load %arg9[%c0_90, %c0_91] : memref<64x128xf32, #tpu.memory_space<vmem>>, vector<64x128xf32>
    %cst_92 = arith.constant dense<0.000000e+00> : vector<16x128xf32>
    %182 = tpu.matmul %180, %181, %cst_92 {dimension_numbers = #tpu.dot_dimension_numbers<[1], [0], [0], [1], [0, 0, 1, 1], [], []>} : vector<16x64xf32>, vector<64x128xf32>, vector<16x128xf32> -> vector<16x128xf32>
    %c8 = arith.constant 8 : index
    %c0_93 = arith.constant 0 : index
    %183 = vector.load %arg10[%c8, %c0_93] : memref<13x128xf32, #tpu.memory_space<vmem>>, vector<1x128xf32>
    %184 = vector.broadcast %183 : vector<1x128xf32> to vector<16x128xf32>
    %185 = arith.addf %182, %184 : vector<16x128xf32>
    %c0_94 = arith.constant 0 : index
    %c0_95 = arith.constant 0 : index
    %186 = vector.load %arg11[%c0_94, %c0_95] : memref<16x128xf32, #tpu.memory_space<vmem>>, vector<16x128xf32>
    tpu.vector_store %arg11[%c0_94, %c0_95], %185 {strides = array<i32>} : memref<16x128xf32, #tpu.memory_space<vmem>>, vector<16x128xf32>,
    return
  }
  func.func @transform_0(%arg0: i32) -> (i32, i32) {
    %c0_i32 = arith.constant 0 : i32
    %c0_i32_0 = arith.constant 0 : i32
    return %arg0, %c0_i32 : i32, i32
  }
  func.func @transform_1(%arg0: i32) -> (i32, i32) {
    %c0_i32 = arith.constant 0 : i32
    %c0_i32_0 = arith.constant 0 : i32
    %c0_i32_1 = arith.constant 0 : i32
    return %c0_i32, %c0_i32_0 : i32, i32
  }
  func.func @transform_2(%arg0: i32) -> (i32, i32, i32) {
    %c0_i32 = arith.constant 0 : i32
    %c0_i32_0 = arith.constant 0 : i32
    %c0_i32_1 = arith.constant 0 : i32
    %c0_i32_2 = arith.constant 0 : i32
    return %c0_i32, %c0_i32_0, %c0_i32_1 : i32, i32, i32
  }
  func.func @transform_3(%arg0: i32) -> (i32, i32) {
    %c0_i32 = arith.constant 0 : i32
    %c0_i32_0 = arith.constant 0 : i32
    %c0_i32_1 = arith.constant 0 : i32
    return %c0_i32, %c0_i32_0 : i32, i32
  }
  func.func @transform_4(%arg0: i32) -> (i32, i32, i32) {
    %c0_i32 = arith.constant 0 : i32
    %c0_i32_0 = arith.constant 0 : i32
    %c0_i32_1 = arith.constant 0 : i32
    %c0_i32_2 = arith.constant 0 : i32
    return %c0_i32, %c0_i32_0, %c0_i32_1 : i32, i32, i32
  }
  func.func @transform_5(%arg0: i32) -> (i32, i32) {
    %c0_i32 = arith.constant 0 : i32
    %c0_i32_0 = arith.constant 0 : i32
    %c0_i32_1 = arith.constant 0 : i32
    return %c0_i32, %c0_i32_0 : i32, i32
  }
  func.func @transform_6(%arg0: i32) -> (i32, i32) {
    %c0_i32 = arith.constant 0 : i32
    %c0_i32_0 = arith.constant 0 : i32
    %c0_i32_1 = arith.constant 0 : i32
    return %c0_i32, %c0_i32_0 : i32, i32
  }
  func.func @transform_7(%arg0: i32) -> (i32, i32) {
    %c0_i32 = arith.constant 0 : i32
    %c0_i32_0 = arith.constant 0 : i32
    %c0_i32_1 = arith.constant 0 : i32
    return %c0_i32, %c0_i32_0 : i32, i32
  }
  func.func @transform_8(%arg0: i32) -> (i32, i32) {
    %c0_i32 = arith.constant 0 : i32
    %c0_i32_0 = arith.constant 0 : i32
    %c0_i32_1 = arith.constant 0 : i32
    return %c0_i32, %c0_i32_0 : i32, i32
  }
  func.func @transform_9(%arg0: i32) -> (i32, i32) {
    %c0_i32 = arith.constant 0 : i32
    %c0_i32_0 = arith.constant 0 : i32
    %c0_i32_1 = arith.constant 0 : i32
    return %c0_i32, %c0_i32_0 : i32, i32
  }
  func.func @transform_10(%arg0: i32) -> (i32, i32) {
    %c0_i32 = arith.constant 0 : i32
    %c0_i32_0 = arith.constant 0 : i32
    return %arg0, %c0_i32 : i32, i32
  }
}

</mosaic_0001>

<bundles_post_ra>
// kernel: tpu_custom_call.1
= control target key start
LH: loop header
LB: loop body
LE: loop exit
PB: predicated region body
PF: predicated region fallthrough
CT: control target
= control target key end

     0   :  { %vm46_vm0 = vcmask 261120   ;;  %s1553_s0 = inlined_call_operand.vmem [shape: f32[16,32], index: 0, kind: input, shape index: {}]   ;;  %s1554_s1 = inlined_call_operand.vmem [shape: f32[16,16], index: 1, kind: input, shape index: {}]   ;;  %s1555_s2 = inlined_call_operand.vmem [shape: f32[4,32,8], index: 2, kind: input, shape index: {}]   ;;  %s1556_s3 = inlined_call_operand.vmem [shape: f32[64,32], index: 3, kind: input, shape index: {}]   ;;  %s1557_s4 = inlined_call_operand.vmem [shape: f32[4,8,32], index: 4, kind: input, shape index: {}]   ;;  %s1558_s5 = inlined_call_operand.vmem [shape: f32[32,64], index: 5, kind: input, shape index: {}]   ;;  %s1559_s6 = inlined_call_operand.vmem [shape: f32[64,32], index: 6, kind: input, shape index: {}]   ;;  %s1560_s7 = inlined_call_operand.vmem [shape: f32[32,64], index: 7, kind: input, shape index: {}]   ;;  %s1561_s8 = inlined_call_operand.vmem [shape: f32[64,128], index: 8, kind: input, shape index: {}]   ;;  %s1562_s9 = inlined_call_operand.vmem [shape: f32[13,128], index: 9, kind: input, shape index: {}]   ;;  %s1563_s10 = inlined_call_operand.hbm [shape: f32[16,128], index: 10, kind: output, shape index: {}]  }
   0x1   :  { %v123_v0 = vld [vmem:[%s1555_s2 + $0x18] sm:$0xff]  ;;  %v1227_v1 = vld [vmem:[%s1553_s0 + $0x8] sm:$0xff]  ;;  %v122_v2 = vld [vmem:[%s1555_s2 + $0x10] sm:$0xff] }
   0x2   :  { %138 = vmatpush.msra.mxu1 %v123_v0  ;;  %1004 = vmatpush.xpose.msk.msra.mxu0 %vm46_vm0, %v1227_v1  ;;  %v121_v3 = vld [vmem:[%s1555_s2 + $0x8] sm:$0xff]  ;;  %v1240_v4 = vld [vmem:[%s1553_s0] sm:$0xff] }
   0x3   :  { %v120_v5 = vld [vmem:[%s1555_s2] sm:$0xff] }
   0x4   :  { %139 = vmatpush.msra.mxu1 %v122_v2  ;;  %v38_v6 = vld [vmem:[%s1556_s3] sm:$0xff] }
   0x6   :  { %140 = vmatpush.msra.mxu1 %v121_v3  ;;  %1005 = vmatpush.xpose.msk.msra.mxu0 %vm46_vm0, %v1240_v4 }
   0x8   :  { %141 = vmatpush.msra.mxu1 %v120_v5 }
   0x9   :  { %15 = vsyncpa [#allocation3], 0  ;;  %1014 = vmatmul.msk.f32.vlgmr.msra.gmra.mxu1 %vm46_vm0, %v1240_v4  ;;  %1006 = vmatmul.msk.f32.vlgmr.msra.gmra.mxu0 %vm46_vm0, %v38_v6  ;;  %v1077_v7 = vld [vmem:[%s1562_s9 + $0x9] ss:$0 sm:$0xff]  ;;  %vm149_vm1 = vcmask 64512   ;;  %v40_v14 = vld [vmem:[%s1556_s3 + $0x10] sm:$0xff] }
   0xa   :  { %v39_v13 = vld [vmem:[%s1556_s3 + $0x8] sm:$0xff]  ;;  %v41_v15 = vld [vmem:[%s1556_s3 + $0x18] sm:$0xff]  ;;  %v1275_v16 = vld [vmem:[%s1554_s1] sm:$0xff]  ;;  %vm179_vm2 = vcmask 130048   ;;  %vm828_vm10 = vcmask 523264   ;;  %s992_s28 = sshll.u32 %s1563_s10, 4  ;;  %s993_s28 = int_to_ptr.hbm [resolvable:$true] %s992_s28 }
   0xb   :  { %v42_v19 = vld [vmem:[%s1556_s3 + $0x20] sm:$0xff]  ;;  %v1286_v21 = vld [vmem:[%s1554_s1 + $0x8] sm:$0xff]  ;;  %v1024_v25 = vld [vmem:[%s1555_s2 + $0x38] sm:$0xff]  ;;  %s1164_s29 = smov 128   ;;  %s1165_s30 = smov 8  }
   0xc   :  { %v1023_v26 = vld [vmem:[%s1555_s2 + $0x30] sm:$0xff]  ;;  %v1022_v27 = vld [vmem:[%s1555_s2 + $0x28] sm:$0xff]  ;;  %v1021_v28 = vld [vmem:[%s1555_s2 + $0x20] sm:$0xff] }
   0xd   :  { %v1032_v30 = vld [vmem:[%s1557_s4 + $0x8] sm:$0xff]  ;;  %v44_v45 = vld [vmem:[%s1556_s3 + $0x30] sm:$0xff]  ;;  %v234_v57 = vld [vmem:[%s1557_s4] sm:$0xff] }
   0xe   :  { %v43_v44 = vld [vmem:[%s1556_s3 + $0x28] sm:$0xff] }
   0xf   :  { %v1078_v53 = vld [vmem:[%s1562_s9 + $0xa] ss:$0 sm:$0xff] }
  0x11   :  { %1015 = vmatmul.msk.f32.gmra.mxu1 %vm46_vm0, %v1227_v1  ;;  %1007 = vmatmul.msk.f32.gmra.mxu0 %vm46_vm0, %v39_v13 }
  0x19   :  { %1008 = vmatmul.msk.f32.gmra.mxu0 %vm46_vm0, %v40_v14 }
  0x21   :  { %1009 = vmatmul.msk.f32.gmra.mxu0 %vm46_vm0, %v41_v15 }
  0x29   :  { %1010 = vmatmul.msk.f32.gmra.mxu0 %vm46_vm0, %v42_v19  ;;  %v1038_v19 = vld [vmem:[%s1555_s2 + $0x48] sm:$0xff] }
  0x31   :  { %1011 = vmatmul.msk.f32.gmra.mxu0 %vm46_vm0, %v43_v44  ;;  %v1053_v44 = vld [vmem:[%s1555_s2 + $0x70] sm:$0xff] }
  0x39   :  { %1012 = vmatmul.msk.f32.gmra.mxu0 %vm46_vm0, %v44_v45  ;;  %v1052_v45 = vld [vmem:[%s1555_s2 + $0x68] sm:$0xff] }
  0x86   :  { %v143_v8 = vpop.f32.mrf.mxu1  ;;  %v94_v9 = vpop.f32.mrf.mxu0 }
  0x87   :  { %v144_v10 = vadd.f32 %v1077_v7, %v143_v8  ;;  %171 = vmatpush.msra.mxu2 %v94_v9 }
  0x89   :  { %1016 = vmatmul.msk.f32.vlgmr.msra.gmra.mxu2 %vm149_vm1, %v144_v10 }
  0x8a   :  { %254 = vmatpush.msrb.mxu2 %v1024_v25 }
  0x8c   :  { %255 = vmatpush.msrb.mxu2 %v1023_v26 }
  0x8e   :  { %v146_v11 = vpop.f32.mrf.mxu1  ;;  %256 = vmatpush.msrb.mxu2 %v1022_v27  ;;  %v97_v29 = vpop.f32.mrf.mxu0 }
  0x8f   :  { %v147_v12 = vadd.f32 %v1077_v7, %v146_v11 }
  0x90   :  { %257 = vmatpush.msrb.mxu2 %v1021_v28 }
  0x91   :  { %1017 = vmatmul.msk.f32.gmra.mxu2 %vm149_vm1, %v147_v12 }
  0x92   :  { %371 = vmatpush.msra.mxu2 %v1032_v30  ;;  %v1079_v30 = vld [vmem:[%s1562_s9 + $0xb] ss:$0 sm:$0xff] }
  0x96   :  { %v100_v31 = vpop.f32.mrf.mxu0 }
  0x99   :  { %1025 = vmatmul.msk.f32.vlgmr.msrb.gmra.mxu2 %vm46_vm0, %v1240_v4 }
  0x9a   :  { %459 = vmatpush.msrb.mxu2 %v100_v31 }
  0x9e   :  { %v103_v35 = vpop.f32.mrf.mxu0 }
  0xa1   :  { %1026 = vmatmul.msk.f32.gmra.mxu2 %vm46_vm0, %v1227_v1 }
  0xa6   :  { %v106_v41 = vpop.f32.mrf.mxu0 }
  0xa7   :  { %1018 = vmatpush.xpose.msk.msra.mxu3 %vm179_vm2, %v106_v41 }
  0xab   :  { %286 = vmatpush.msrb.mxu3 %v97_v29 }
  0xae   :  { %v109_v58 = vpop.f32.mrf.mxu0 }
  0xaf   :  { %1029 = vmatpush.xpose.msk.msrb.mxu1 %vm179_vm2, %v109_v58 }
  0xb6   :  { %v112_v59 = vpop.f32.mrf.mxu0 }
 0x10c   :  { %v173_v17 = vpop.f32.mrf.mxu2 }
 0x10d   :  { %v174_v18 = vadd.f32 %v173_v17, %v1275_v16  ;;  %v1040_v17 = vld [vmem:[%s1555_s2 + $0x58] sm:$0xff] }
 0x10e   :  { %427 = vmatpush.msra.mxu1 %v1040_v17 }
 0x10f   :  { %v180_v20 = vsel %vm179_vm2, %v174_v18, -inf }
 0x110   :  { %181 = vmax.xlane.f32.xlu0 %v180_v20  ;;  %v1037_v20 = vld [vmem:[%s1555_s2 + $0x40] sm:$0xff] }
 0x114   :  { %v176_v22 = vpop.f32.mrf.mxu2 }
 0x115   :  { %v177_v23 = vadd.f32 %v176_v22, %v1286_v21 }
 0x117   :  { %v183_v24 = vsel %vm179_vm2, %v177_v23, -inf }
 0x118   :  { %184 = vmax.xlane.f32.xlu0 %v183_v24 }
 0x11c   :  { %v259_v52 = vpop.f32.mrf.mxu2 }
 0x11d   :  { %v260_v54 = vadd.f32 %v1078_v53, %v259_v52 }
 0x124   :  { %v262_v55 = vpop.f32.mrf.mxu2 }
 0x125   :  { %v263_v56 = vadd.f32 %v1078_v53, %v262_v55 }
 0x183   :  { %v182_v32 = vpop.xlane.xlu0 %181 }
 0x184   :  { %v186_v33 = vsub.f32 %v174_v18, %v182_v32  ;;  %v1039_v18 = vld [vmem:[%s1555_s2 + $0x50] sm:$0xff] }
 0x185   :  { %428 = vmatpush.msra.mxu1 %v1039_v18 }
 0x186   :  { %v188_v34 = vmul.f32 1.442695, %v186_v33 }
 0x187   :  { %429 = vmatpush.msra.mxu1 %v1038_v19 }
 0x188   :  { %1090 = vpow2.f32 %v188_v34 }
 0x189   :  { %430 = vmatpush.msra.mxu1 %v1037_v20 }
 0x18b   :  { %v185_v36 = vpop.xlane.xlu0 %184 }
 0x18c   :  { %v187_v37 = vsub.f32 %v177_v23, %v185_v36 }
 0x18e   :  { %v1091_v38 = vpop.eup %1090  ;;  %v190_v39 = vmul.f32 1.442695, %v187_v37 }
 0x18f   :  { %v192_v40 = vsel %vm179_vm2, %v1091_v38, 0.0 }
 0x190   :  { %1092 = vpow2.f32 %v190_v39  ;;  %193 = vadd.xlane.f32.xlu1 %v192_v40 }
 0x196   :  { %v1093_v42 = vpop.eup %1092 }
 0x197   :  { %v195_v43 = vsel %vm179_vm2, %v1093_v42, 0.0 }
 0x198   :  { %196 = vadd.xlane.f32.xlu1 %v195_v43  ;;  %v1054_v43 = vld [vmem:[%s1555_s2 + $0x78] sm:$0xff] }
 0x203   :  { %v194_v46 = vpop.xlane.xlu1 %193 }
 0x204   :  { %1094 = vrcp.f32 %v194_v46  ;;  %v1051_v46 = vld [vmem:[%s1555_s2 + $0x60] sm:$0xff] }
 0x20a   :  { %v1095_v47 = vpop.eup %1094 }
 0x20b   :  { %v197_v48 = vpop.xlane.xlu1 %196  ;;  %v200_v49 = vmul.f32 %v1095_v47, %v1091_v38 }
 0x20c   :  { %1096 = vrcp.f32 %v197_v48 }
 0x20d   :  { %1019 = vmatmul.msk.f32.vlgmr.msra.gmra.mxu3 %vm179_vm2, %v200_v49 }
 0x20e   :  { %400 = vmatpush.msra.mxu3 %v234_v57 }
 0x212   :  { %v1097_v50 = vpop.eup %1096 }
 0x213   :  { %v201_v51 = vmul.f32 %v1097_v50, %v1093_v42 }
 0x215   :  { %1020 = vmatmul.msk.f32.gmra.mxu3 %vm179_vm2, %v201_v51 }
 0x21d   :  { %1027 = vmatmul.msk.f32.vlgmr.msrb.gmra.mxu3 %vm149_vm1, %v260_v54 }
 0x21e   :  { %1045 = vmatpush.xpose.msk.msrb.mxu3 %vm179_vm2, %v112_v59 }
 0x225   :  { %1028 = vmatmul.msk.f32.gmra.mxu3 %vm149_vm1, %v263_v56 }
 0x290   :  { %v228_v60 = vpop.f32.mrf.mxu3 }
 0x291   :  { %1035 = vmatmul.msk.f32.vlgmr.msra.gmra.mxu3 %vm149_vm1, %v228_v60 }
 0x292   :  { %605 = vmatpush.msra.mxu3 %v103_v35 }
 0x298   :  { %v231_v61 = vpop.f32.mrf.mxu3 }
 0x299   :  { %1036 = vmatmul.msk.f32.gmra.mxu3 %vm149_vm1, %v231_v61 }
 0x2a0   :  { %v288_v62 = vpop.f32.mrf.mxu3 }
 0x2a1   :  { %v289_v63 = vadd.f32 %v288_v62, %v1275_v16 }
 0x2a3   :  { %v294_v0 = vsel %vm179_vm2, %v289_v63, -inf }
 0x2a4   :  { %295 = vmax.xlane.f32.xlu2 %v294_v0  ;;  %v1080_v0 = vld [vmem:[%s1562_s9 + $0xc] ss:$0 sm:$0xff] }
 0x2a8   :  { %v291_v2 = vpop.f32.mrf.mxu3 }
 0x2a9   :  { %v292_v3 = vadd.f32 %v291_v2, %v1286_v21 }
 0x2ab   :  { %v297_v5 = vsel %vm179_vm2, %v292_v3, -inf }
 0x2ac   :  { %298 = vmax.xlane.f32.xlu2 %v297_v5 }
 0x317   :  { %v296_v6 = vpop.xlane.xlu2 %295 }
 0x318   :  { %v300_v7 = vsub.f32 %v289_v63, %v296_v6  ;;  %v1048_v6 = vld [vmem:[%s1557_s4 + $0x10] sm:$0xff] }
 0x31a   :  { %v302_v8 = vmul.f32 1.442695, %v300_v7  ;;  %v402_v7 = vpop.f32.mrf.mxu3 }
 0x31c   :  { %1098 = vpow2.f32 %v302_v8 }
 0x31f   :  { %v299_v9 = vpop.xlane.xlu2 %298 }
 0x320   :  { %v301_v10 = vsub.f32 %v292_v3, %v299_v9  ;;  %v45_v9 = vld [vmem:[%s1556_s3 + $0x38] sm:$0xff] }
 0x321   :  { %1013 = vmatmul.msk.f32.gmra.mxu0 %vm46_vm0, %v45_v9  ;;  %v767_v9 = vld [vmem:[%s1558_s5 + $0x10] sm:$0xff] }
 0x322   :  { %v1099_v11 = vpop.eup %1098  ;;  %v304_v12 = vmul.f32 1.442695, %v301_v10  ;;  %v405_v8 = vpop.f32.mrf.mxu3 }
 0x323   :  { %v306_v13 = vsel %vm179_vm2, %v1099_v11, 0.0 }
 0x324   :  { %1100 = vpow2.f32 %v304_v12  ;;  %307 = vadd.xlane.f32.xlu0 %v306_v13 }
 0x32a   :  { %v1101_v14 = vpop.eup %1100 }
 0x32b   :  { %v309_v15 = vsel %vm179_vm2, %v1101_v14, 0.0 }
 0x32c   :  { %310 = vadd.xlane.f32.xlu1 %v309_v15 }
 0x397   :  { %v308_v22 = vpop.xlane.xlu0 %307 }
 0x398   :  { %1102 = vrcp.f32 %v308_v22 }
 0x39e   :  { %v1103_v23 = vpop.eup %1102  ;;  %v115_v19 = vpop.f32.mrf.mxu0 }
 0x39f   :  { %v311_v24 = vpop.xlane.xlu1 %310  ;;  %v314_v25 = vmul.f32 %v1103_v23, %v1099_v11  ;;  %1059 = vmatpush.xpose.msk.msrb.mxu0 %vm179_vm2, %v115_v19 }
 0x3a0   :  { %1104 = vrcp.f32 %v311_v24 }
 0x3a1   :  { %1030 = vmatmul.msk.f32.vlgmr.msrb.gmra.mxu1 %vm179_vm2, %v314_v25 }
 0x3a2   :  { %544 = vmatpush.msrb.mxu1 %v1048_v6 }
 0x3a6   :  { %v1105_v26 = vpop.eup %1104 }
 0x3a7   :  { %v315_v27 = vmul.f32 %v1105_v26, %v1101_v14 }
 0x3a9   :  { %1031 = vmatmul.msk.f32.gmra.mxu1 %vm179_vm2, %v315_v27 }
 0x3b1   :  { %1041 = vmatmul.msk.f32.vlgmr.msra.gmra.mxu1 %vm46_vm0, %v1240_v4 }
 0x3b9   :  { %1042 = vmatmul.msk.f32.gmra.mxu1 %vm46_vm0, %v1227_v1 }
 0x41e   :  { %v342_v28 = vpop.f32.mrf.mxu1 }
 0x41f   :  { %1033 = vmatmul.msk.f32.vlgmr.msra.gmra.mxu2 %vm149_vm1, %v342_v28 }
 0x420   :  { %573 = vmatpush.msra.mxu2 %v1054_v43 }
 0x422   :  { %574 = vmatpush.msra.mxu2 %v1053_v44  ;;  %v1081_v44 = vld [vmem:[%s1562_s9] ss:$0 sm:$0xff] }
 0x424   :  { %575 = vmatpush.msra.mxu2 %v1052_v45 }
 0x426   :  { %v345_v29 = vpop.f32.mrf.mxu1  ;;  %576 = vmatpush.msra.mxu2 %v1051_v46 }
 0x427   :  { %1034 = vmatmul.msk.f32.gmra.mxu2 %vm149_vm1, %v345_v29  ;;  %v1062_v29 = vld [vmem:[%s1557_s4 + $0x18] sm:$0xff] }
 0x428   :  { %690 = vmatpush.msra.mxu1 %v1062_v29 }
 0x42e   :  { %v432_v31 = vpop.f32.mrf.mxu1 }
 0x42f   :  { %v433_v32 = vadd.f32 %v1079_v30, %v432_v31 }
 0x431   :  { %1043 = vmatmul.msk.f32.vlgmr.msrb.gmra.mxu2 %vm149_vm1, %v433_v32 }
 0x436   :  { %v435_v33 = vpop.f32.mrf.mxu1 }
 0x437   :  { %v436_v34 = vadd.f32 %v1079_v30, %v435_v33 }
 0x439   :  { %1044 = vmatmul.msk.f32.gmra.mxu2 %vm149_vm1, %v436_v34 }
 0x441   :  { %1055 = vmatmul.msk.f32.vlgmr.msra.gmra.mxu2 %vm46_vm0, %v1240_v4 }
 0x449   :  { %1056 = vmatmul.msk.f32.gmra.mxu2 %vm46_vm0, %v1227_v1 }
 0x4a2   :  { %v1365_v35 = vpop.f32.mrf.mxu2 }
 0x4aa   :  { %v1367_v36 = vpop.f32.mrf.mxu2 }
 0x4b4   :  { %v461_v37 = vpop.f32.mrf.mxu2 }
 0x4b5   :  { %v462_v38 = vadd.f32 %v461_v37, %v1275_v16 }
 0x4b7   :  { %v467_v39 = vsel %vm179_vm2, %v462_v38, -inf }
 0x4b8   :  { %468 = vmax.xlane.f32.xlu2 %v467_v39 }
 0x4bc   :  { %v464_v40 = vpop.f32.mrf.mxu2 }
 0x4bd   :  { %v465_v41 = vadd.f32 %v464_v40, %v1286_v21 }
 0x4bf   :  { %v470_v42 = vsel %vm179_vm2, %v465_v41, -inf }
 0x4c0   :  { %471 = vmax.xlane.f32.xlu0 %v470_v42  ;;  %v403_v42 = vadd.f32 %v402_v7, %v1365_v35 }
 0x4c4   :  { %v578_v63 = vpop.f32.mrf.mxu2 }
 0x4c5   :  { %v579_v2 = vadd.f32 %v1080_v0, %v578_v63 }
 0x4cc   :  { %v581_v3 = vpop.f32.mrf.mxu2 }
 0x4cd   :  { %v582_v5 = vadd.f32 %v1080_v0, %v581_v3 }
 0x52b   :  { %v469_v47 = vpop.xlane.xlu2 %468 }
 0x52c   :  { %v473_v48 = vsub.f32 %v462_v38, %v469_v47 }
 0x52e   :  { %v475_v49 = vmul.f32 1.442695, %v473_v48  ;;  %v406_v48 = vadd.f32 %v405_v8, %v1367_v36  ;;  %v768_v8 = vld [vmem:[%s1558_s5 + $0x18] sm:$0xff] }
 0x52f   :  { %789 = vmatpush.msrb.mxu2 %v768_v8  ;;  %v1085_v8 = vld [vmem:[%s1562_s9 + $0x4] ss:$0 sm:$0xff] }
 0x530   :  { %1106 = vpow2.f32 %v475_v49 }
 0x531   :  { %790 = vmatpush.msrb.mxu2 %v767_v9 }
 0x533   :  { %v472_v50 = vpop.xlane.xlu0 %471 }
 0x534   :  { %v474_v51 = vsub.f32 %v465_v41, %v472_v50 }
 0x536   :  { %v1107_v52 = vpop.eup %1106  ;;  %v477_v53 = vmul.f32 1.442695, %v474_v51 }
 0x537   :  { %v479_v54 = vsel %vm179_vm2, %v1107_v52, 0.0 }
 0x538   :  { %1108 = vpow2.f32 %v477_v53  ;;  %480 = vadd.xlane.f32.xlu1 %v479_v54 }
 0x53e   :  { %v1109_v55 = vpop.eup %1108 }
 0x53f   :  { %v482_v56 = vsel %vm179_vm2, %v1109_v55, 0.0 }
 0x540   :  { %483 = vadd.xlane.f32.xlu2 %v482_v56  ;;  %v1162_v56 = vmov 32.0  }
 0x5ab   :  { %v481_v57 = vpop.xlane.xlu1 %480 }
 0x5ac   :  { %1110 = vrcp.f32 %v481_v57 }
 0x5b2   :  { %v1111_v58 = vpop.eup %1110 }
 0x5b3   :  { %v487_v59 = vmul.f32 %v1111_v58, %v1107_v52  ;;  %v484_v60 = vpop.xlane.xlu2 %483 }
 0x5b4   :  { %1112 = vrcp.f32 %v484_v60 }
 0x5b5   :  { %1046 = vmatmul.msk.f32.vlgmr.msrb.gmra.mxu3 %vm179_vm2, %v487_v59 }
 0x5ba   :  { %v1113_v61 = vpop.eup %1112 }
 0x5bb   :  { %v488_v62 = vmul.f32 %v1113_v61, %v1109_v55 }
 0x5bd   :  { %1047 = vmatmul.msk.f32.gmra.mxu3 %vm179_vm2, %v488_v62 }
 0x5c5   :  { %1057 = vmatmul.msk.f32.vlgmr.msra.gmra.mxu3 %vm149_vm1, %v579_v2 }
 0x5cd   :  { %1058 = vmatmul.msk.f32.gmra.mxu3 %vm149_vm1, %v582_v5 }
 0x638   :  { %v515_v10 = vpop.f32.mrf.mxu3 }
 0x639   :  { %1049 = vmatmul.msk.f32.vlgmr.msrb.gmra.mxu1 %vm149_vm1, %v515_v10  ;;  %v766_v10 = vld [vmem:[%s1558_s5 + $0x8] sm:$0xff] }
 0x63a   :  { %791 = vmatpush.msrb.mxu2 %v766_v10 }
 0x640   :  { %v518_v11 = vpop.f32.mrf.mxu3 }
 0x641   :  { %1050 = vmatmul.msk.f32.gmra.mxu1 %vm149_vm1, %v518_v11  ;;  %v765_v11 = vld [vmem:[%s1558_s5] sm:$0xff] }
 0x642   :  { %792 = vmatpush.msrb.mxu2 %v765_v11 }
 0x648   :  { %v607_v12 = vpop.f32.mrf.mxu3 }
 0x649   :  { %v608_v13 = vadd.f32 %v607_v12, %v1275_v16 }
 0x64b   :  { %v613_v14 = vsel %vm179_vm2, %v608_v13, -inf }
 0x64c   :  { %614 = vmax.xlane.f32.xlu0 %v613_v14 }
 0x650   :  { %v610_v15 = vpop.f32.mrf.mxu3 }
 0x651   :  { %v611_v17 = vadd.f32 %v610_v15, %v1286_v21 }
 0x653   :  { %v616_v18 = vsel %vm179_vm2, %v611_v17, -inf }
 0x654   :  { %617 = vmax.xlane.f32.xlu1 %v616_v18 }
 0x6b6   :  { %v546_v40 = vpop.f32.mrf.mxu1 }
 0x6b7   :  { %v552_v43 = vadd.f32 %v546_v40, %v403_v42  ;;  %v825_v42 = vld [vmem:[%s1559_s6 + $0x38] sm:$0xff] }
 0x6b8   :  { %843 = vmatpush.msrb.mxu3 %v825_v42  ;;  %v948_v42 = vld [vmem:[%s1561_s8 + $0x18] sm:$0xff] }
 0x6be   :  { %v549_v41 = vpop.f32.mrf.mxu1 }
 0x6bf   :  { %v615_v20 = vpop.xlane.xlu0 %614  ;;  %v553_v50 = vadd.f32 %v549_v41, %v406_v48  ;;  %v819_v48 = vld [vmem:[%s1559_s6 + $0x8] sm:$0xff] }
 0x6c0   :  { %v619_v22 = vsub.f32 %v608_v13, %v615_v20 }
 0x6c2   :  { %v621_v23 = vmul.f32 1.442695, %v619_v22 }
 0x6c4   :  { %1114 = vpow2.f32 %v621_v23 }
 0x6c7   :  { %v618_v24 = vpop.xlane.xlu1 %617 }
 0x6c8   :  { %v620_v25 = vsub.f32 %v611_v17, %v618_v24 }
 0x6ca   :  { %v1115_v26 = vpop.eup %1114  ;;  %v623_v16 = vmul.f32 1.442695, %v620_v25 }
 0x6cb   :  { %v625_v27 = vsel %vm179_vm2, %v1115_v26, 0.0 }
 0x6cc   :  { %1116 = vpow2.f32 %v623_v16  ;;  %626 = vadd.xlane.f32.xlu2 %v625_v27  ;;  %v1082_v27 = vld [vmem:[%s1562_s9 + $0x1] ss:$0 sm:$0xff] }
 0x6d2   :  { %v1117_v28 = vpop.eup %1116 }
 0x6d3   :  { %v628_v21 = vsel %vm179_vm2, %v1117_v28, 0.0 }
 0x6d4   :  { %629 = vadd.xlane.f32.xlu0 %v628_v21 }
 0x73f   :  { %v627_v30 = vpop.xlane.xlu2 %626 }
 0x740   :  { %1118 = vrcp.f32 %v627_v30  ;;  %v1083_v30 = vld [vmem:[%s1562_s9 + $0x2] ss:$0 sm:$0xff] }
 0x746   :  { %v1119_v31 = vpop.eup %1118 }
 0x747   :  { %v630_v32 = vpop.xlane.xlu0 %629  ;;  %v633_v33 = vmul.f32 %v1119_v31, %v1115_v26 }
 0x748   :  { %1120 = vrcp.f32 %v630_v32 }
 0x749   :  { %1060 = vmatmul.msk.f32.vlgmr.msrb.gmra.mxu0 %vm179_vm2, %v633_v33  ;;  %1122 = vrcp.f32 %v1162_v56 }
 0x74e   :  { %v1121_v34 = vpop.eup %1120 }
 0x74f   :  { %v634_v37 = vmul.f32 %v1121_v34, %v1117_v28  ;;  %v1123_v57 = vpop.eup %1122 }
 0x750   :  { %v715_v58 = vmul.f32 32.0, %v1123_v57  ;;  %vm719_vm3 = vweird.f32 %v1123_v57 }
 0x751   :  { %1061 = vmatmul.msk.f32.gmra.mxu0 %vm179_vm2, %v634_v37 }
 0x752   :  { %v716_v59 = vsub.f32 1.0, %v715_v58 }
 0x754   :  { %v717_v36 = vmul.f32 %v1123_v57, %v716_v59 }
 0x756   :  { %v718_v60 = vadd.f32 %v1123_v57, %v717_v36 }
 0x7c6   :  { %v661_v38 = vpop.f32.mrf.mxu0 }
 0x7c7   :  { %1063 = vmatmul.msk.f32.vlgmr.msra.gmra.mxu1 %vm149_vm1, %v661_v38 }
 0x7ce   :  { %v664_v39 = vpop.f32.mrf.mxu0 }
 0x7cf   :  { %1064 = vmatmul.msk.f32.gmra.mxu1 %vm149_vm1, %v664_v39 }
 0x844   :  { %v692_v45 = vpop.f32.mrf.mxu1 }
 0x845   :  { %v698_v46 = vadd.f32 %v692_v45, %v552_v43  ;;  %v824_v43 = vld [vmem:[%s1559_s6 + $0x30] sm:$0xff]  ;;  %v822_v45 = vld [vmem:[%s1559_s6 + $0x20] sm:$0xff] }
 0x846   :  { %844 = vmatpush.msrb.mxu3 %v824_v43 }
 0x847   :  { %v702_v47 = vadd.f32 %v1081_v44, %v698_v46  ;;  %v821_v46 = vld [vmem:[%s1559_s6 + $0x18] sm:$0xff] }
 0x849   :  { %v704_v49 = vadd.f32 %v702_v47, %v1240_v4  ;;  %v1430_v4 = vsel %vm719_vm3, %v1123_v57, %v718_v60  ;;  %v820_v47 = vld [vmem:[%s1559_s6 + $0x10] sm:$0xff] }
 0x84b   :  { %v708_v51 = vsel %vm46_vm0, %v704_v49, 0.0 }
 0x84c   :  { %709 = vadd.xlane.f32.xlu1 %v708_v51  ;;  %v695_v52 = vpop.f32.mrf.mxu1 }
 0x84d   :  { %v699_v53 = vadd.f32 %v695_v52, %v553_v50  ;;  %v1084_v50 = vld [vmem:[%s1562_s9 + $0x3] ss:$0 sm:$0xff] }
 0x84f   :  { %v703_v54 = vadd.f32 %v1081_v44, %v699_v53  ;;  %v823_v44 = vld [vmem:[%s1559_s6 + $0x28] sm:$0xff] }
 0x850   :  { %845 = vmatpush.msrb.mxu3 %v823_v44  ;;  %v947_v44 = vld [vmem:[%s1561_s8 + $0x10] sm:$0xff] }
 0x851   :  { %v705_v35 = vadd.f32 %v703_v54, %v1227_v1 }
 0x852   :  { %846 = vmatpush.msrb.mxu3 %v822_v45 }
 0x853   :  { %v711_v55 = vsel %vm46_vm0, %v705_v35, 0.0 }
 0x854   :  { %712 = vadd.xlane.f32.xlu2 %v711_v55  ;;  %847 = vmatpush.msrb.mxu3 %v821_v46 }
 0x856   :  { %848 = vmatpush.msrb.mxu3 %v820_v47 }
 0x858   :  { %849 = vmatpush.msrb.mxu3 %v819_v48 }
 0x8bf   :  { %v710_v61 = vpop.xlane.xlu1 %709 }
 0x8c0   :  { %v721_v62 = vmul.f32 %v1430_v4, %v710_v61 }
 0x8c2   :  { %v723_v63 = vsub.f32 %v704_v49, %v721_v62  ;;  %v818_v49 = vld [vmem:[%s1559_s6] sm:$0xff] }
 0x8c3   :  { %850 = vmatpush.msrb.mxu3 %v818_v49 }
 0x8c4   :  { %v725_v0 = vmul.f32 %v723_v63, %v723_v63 }
 0x8c6   :  { %v727_v1 = vsel %vm46_vm0, %v725_v0, 0.0 }
 0x8c7   :  { %728 = vadd.xlane.f32.xlu0 %v727_v1  ;;  %v713_v2 = vpop.xlane.xlu2 %712 }
 0x8c8   :  { %v722_v3 = vmul.f32 %v1430_v4, %v713_v2 }
 0x8ca   :  { %v724_v5 = vsub.f32 %v705_v35, %v722_v3 }
 0x8cc   :  { %v726_v6 = vmul.f32 %v724_v5, %v724_v5 }
 0x8ce   :  { %v730_v7 = vsel %vm46_vm0, %v726_v6, 0.0 }
 0x8cf   :  { %731 = vadd.xlane.f32.xlu1 %v730_v7 }
 0x93a   :  { %v729_v12 = vpop.xlane.xlu0 %728 }
 0x93b   :  { %v733_v13 = vmul.f32 %v729_v12, %v1430_v4 }
 0x93d   :  { %v735_v14 = vadd.f32 1e-05, %v733_v13 }
 0x93f   :  { %1124 = vrsqrt.f32 %v735_v14  ;;  %vm743_vm5 = vweird.f32 %v735_v14 }
 0x942   :  { %v732_v15 = vpop.xlane.xlu1 %731 }
 0x943   :  { %v734_v17 = vmul.f32 %v732_v15, %v1430_v4 }
 0x945   :  { %v1125_v18 = vpop.eup %1124  ;;  %v736_v19 = vadd.f32 1e-05, %v734_v17 }
 0x946   :  { %v738_v20 = vmul.f32 %v1125_v18, %v735_v14  ;;  %vm744_vm4 = vweird.f32 %v1125_v18 }
 0x947   :  { %1126 = vrsqrt.f32 %v736_v19  ;;  %vm745_vm6 = vmor %vm743_vm5, %vm744_vm4  ;;  %vm753_vm8 = vweird.f32 %v736_v19 }
 0x948   :  { %v739_v22 = vmul.f32 %v1125_v18, %v738_v20 }
 0x94a   :  { %v740_v23 = vmul.f32 0.5, %v739_v22 }
 0x94c   :  { %v741_v24 = vsub.f32 1.5, %v740_v23 }
 0x94d   :  { %v1127_v25 = vpop.eup %1126 }
 0x94e   :  { %v742_v26 = vmul.f32 %v1125_v18, %v741_v24  ;;  %v748_v16 = vmul.f32 %v1127_v25, %v736_v19  ;;  %vm754_vm7 = vweird.f32 %v1127_v25 }
 0x94f   :  { %vm755_vm9 = vmor %vm753_vm8, %vm754_vm7 }
 0x950   :  { %v746_v28 = vsel %vm745_vm6, %v1125_v18, %v742_v26  ;;  %v749_v21 = vmul.f32 %v1127_v25, %v748_v16  ;;  %v913_v16 = vld [vmem:[%s1560_s7 + $0x18] sm:$0xff] }
 0x951   :  { %v757_v29 = vmul.f32 %v746_v28, %v723_v63  ;;  %934 = vmatpush.msra.mxu0 %v913_v16  ;;  %v911_v28 = vld [vmem:[%s1560_s7 + $0x8] sm:$0xff] }
 0x952   :  { %v750_v31 = vmul.f32 0.5, %v749_v21  ;;  %v910_v21 = vld [vmem:[%s1560_s7] sm:$0xff] }
 0x953   :  { %v760_v32 = vmul.f32 %v1082_v27, %v757_v29 }
 0x954   :  { %v751_v33 = vsub.f32 1.5, %v750_v31 }
 0x955   :  { %v763_v34 = vadd.f32 %v1083_v30, %v760_v32  ;;  %v952_v32 = vld [vmem:[%s1561_s8 + $0x38] sm:$0xff] }
 0x956   :  { %v752_v37 = vmul.f32 %v1127_v25, %v751_v33  ;;  %v951_v33 = vld [vmem:[%s1561_s8 + $0x30] sm:$0xff]  ;;  %969 = vmatpush.msrb.mxu1 %v952_v32 }
 0x957   :  { %1065 = vmatmul.msk.f32.vlgmr.msrb.gmra.mxu2 %vm46_vm0, %v763_v34  ;;  %v950_v34 = vld [vmem:[%s1561_s8 + $0x28] sm:$0xff] }
 0x958   :  { %v756_v38 = vsel %vm755_vm9, %v1127_v25, %v752_v37  ;;  %970 = vmatpush.msrb.mxu1 %v951_v33 }
 0x959   :  { %v758_v39 = vmul.f32 %v756_v38, %v724_v5 }
 0x95a   :  { %971 = vmatpush.msrb.mxu1 %v950_v34 }
 0x95b   :  { %v761_v40 = vmul.f32 %v1082_v27, %v758_v39  ;;  %v912_v27 = vld [vmem:[%s1560_s7 + $0x10] sm:$0xff]  ;;  %v949_v39 = vld [vmem:[%s1561_s8 + $0x20] sm:$0xff] }
 0x95c   :  { %935 = vmatpush.msra.mxu0 %v912_v27  ;;  %972 = vmatpush.msrb.mxu1 %v949_v39 }
 0x95d   :  { %v764_v41 = vadd.f32 %v1083_v30, %v761_v40 }
 0x95e   :  { %936 = vmatpush.msra.mxu0 %v911_v28  ;;  %973 = vmatpush.msrb.mxu1 %v948_v42 }
 0x95f   :  { %1066 = vmatmul.msk.f32.gmra.mxu2 %vm46_vm0, %v764_v41 }
 0x960   :  { %937 = vmatpush.msra.mxu0 %v910_v21  ;;  %974 = vmatpush.msrb.mxu1 %v947_v44 }
 0x9da   :  { %v794_v51 = vpop.f32.mrf.mxu2 }
 0x9db   :  { %v795_v52 = vadd.f32 %v1084_v50, %v794_v51  ;;  %v1086_v51 = vld [vmem:[%s1562_s9 + $0x5] ss:$0 sm:$0xff] }
 0x9dd   :  { %v802_v53 = vmul.f32 0.044715, %v795_v52  ;;  %v800_v0 = vmul.f32 0.5, %v795_v52 }
 0x9df   :  { %v804_v54 = vmul.f32 %v802_v53, %v795_v52 }
 0x9e1   :  { %v806_v35 = vmul.f32 %v804_v54, %v795_v52 }
 0x9e2   :  { %v797_v55 = vpop.f32.mrf.mxu2 }
 0x9e3   :  { %v808_v56 = vadd.f32 %v806_v35, %v795_v52  ;;  %v798_v57 = vadd.f32 %v1084_v50, %v797_v55  ;;  %v1087_v35 = vld [vmem:[%s1562_s9 + $0x6] ss:$0 sm:$0xff] }
 0x9e5   :  { %v810_v58 = vmul.f32 0.7978846, %v808_v56  ;;  %v803_v59 = vmul.f32 0.044715, %v798_v57  ;;  %v801_v5 = vmul.f32 0.5, %v798_v57 }
 0x9e7   :  { %1128 = vtanh.f32 %v810_v58  ;;  %v805_v36 = vmul.f32 %v803_v59, %v798_v57 }
 0x9e9   :  { %v807_v60 = vmul.f32 %v805_v36, %v798_v57 }
 0x9eb   :  { %v809_v61 = vadd.f32 %v807_v60, %v798_v57 }
 0x9ed   :  { %v1129_v62 = vpop.eup %1128  ;;  %v811_v63 = vmul.f32 0.7978846, %v809_v61 }
 0x9ee   :  { %v814_v1 = vadd.f32 1.0, %v1129_v62 }
 0x9ef   :  { %1130 = vtanh.f32 %v811_v63  ;;  %v945_v63 = vld [vmem:[%s1561_s8] sm:$0xff] }
 0x9f0   :  { %v816_v2 = vmul.f32 %v814_v1, %v800_v0  ;;  %v1088_v0 = vld [vmem:[%s1562_s9 + $0x7] ss:$0 sm:$0xff] }
 0x9f2   :  { %1067 = vmatmul.msk.f32.vlgmr.msrb.gmra.mxu3 %vm828_vm10, %v816_v2 }
 0x9f5   :  { %v1131_v3 = vpop.eup %1130 }
 0x9f6   :  { %v815_v6 = vadd.f32 1.0, %v1131_v3 }
 0x9f8   :  { %v817_v7 = vmul.f32 %v815_v6, %v801_v5  ;;  %v1089_v6 = vld [vmem:[%s1562_s9 + $0x8] ss:$0 sm:$0xff] }
 0x9fa   :  { %1068 = vmatmul.msk.f32.gmra.mxu3 %vm828_vm10, %v817_v7 }
 0xa75   :  { %v852_v9 = vpop.f32.mrf.mxu3 }
 0xa76   :  { %v853_v10 = vadd.f32 %v1085_v8, %v852_v9 }
 0xa78   :  { %v860_v11 = vsel %vm46_vm0, %v853_v10, 0.0 }
 0xa79   :  { %861 = vadd.xlane.f32.xlu2 %v860_v11 }
 0xa7d   :  { %v855_v12 = vpop.f32.mrf.mxu3 }
 0xa7e   :  { %v856_v13 = vadd.f32 %v1085_v8, %v855_v12 }
 0xa80   :  { %v863_v14 = vsel %vm46_vm0, %v856_v13, 0.0 }
 0xa81   :  { %864 = vadd.xlane.f32.xlu0 %v863_v14 }
 0xaec   :  { %v862_v15 = vpop.xlane.xlu2 %861 }
 0xaed   :  { %v866_v17 = vmul.f32 %v862_v15, %v1430_v4 }
 0xaef   :  { %v868_v18 = vsub.f32 %v853_v10, %v866_v17 }
 0xaf1   :  { %v870_v19 = vmul.f32 %v868_v18, %v868_v18 }
 0xaf3   :  { %v872_v20 = vsel %vm46_vm0, %v870_v19, 0.0 }
 0xaf4   :  { %v865_v22 = vpop.xlane.xlu0 %864  ;;  %873 = vadd.xlane.f32.xlu1 %v872_v20 }
 0xaf5   :  { %v867_v23 = vmul.f32 %v865_v22, %v1430_v4 }
 0xaf7   :  { %v869_v24 = vsub.f32 %v856_v13, %v867_v23 }
 0xaf9   :  { %v871_v25 = vmul.f32 %v869_v24, %v869_v24 }
 0xafb   :  { %v875_v26 = vsel %vm46_vm0, %v871_v25, 0.0 }
 0xafc   :  { %876 = vadd.xlane.f32.xlu2 %v875_v26 }
 0xb67   :  { %v874_v29 = vpop.xlane.xlu1 %873 }
 0xb68   :  { %v878_v30 = vmul.f32 %v874_v29, %v1430_v4 }
 0xb6a   :  { %v880_v31 = vadd.f32 1e-05, %v878_v30 }
 0xb6c   :  { %1132 = vrsqrt.f32 %v880_v31  ;;  %vm888_vm12 = vweird.f32 %v880_v31 }
 0xb6f   :  { %v877_v37 = vpop.xlane.xlu2 %876 }
 0xb70   :  { %v879_v38 = vmul.f32 %v877_v37, %v1430_v4  ;;  %v946_v4 = vld [vmem:[%s1561_s8 + $0x8] sm:$0xff]  ;;  %s1163_s8 = smov [#allocation2]  }
 0xb71   :  { %975 = vmatpush.msrb.mxu1 %v946_v4  ;;  %s990_s26 = sshll.u32 %s1163_s8, 4  ;;  %s991_s26 = int_to_ptr.vmem [resolvable:$true] %s990_s26 }
 0xb72   :  { %v1133_v40 = vpop.eup %1132  ;;  %v881_v41 = vadd.f32 1e-05, %v879_v38 }
 0xb73   :  { %v883_v43 = vmul.f32 %v1133_v40, %v880_v31  ;;  %vm889_vm11 = vweird.f32 %v1133_v40  ;;  %976 = vmatpush.msrb.mxu1 %v945_v63 }
 0xb74   :  { %1134 = vrsqrt.f32 %v881_v41  ;;  %vm890_vm13 = vmor %vm888_vm12, %vm889_vm11  ;;  %vm898_vm15 = vweird.f32 %v881_v41 }
 0xb75   :  { %v884_v45 = vmul.f32 %v1133_v40, %v883_v43 }
 0xb77   :  { %v885_v46 = vmul.f32 0.5, %v884_v45 }
 0xb79   :  { %v886_v47 = vsub.f32 1.5, %v885_v46 }
 0xb7a   :  { %v1135_v48 = vpop.eup %1134 }
 0xb7b   :  { %v887_v49 = vmul.f32 %v1133_v40, %v886_v47  ;;  %v893_v50 = vmul.f32 %v1135_v48, %v881_v41  ;;  %vm899_vm14 = vweird.f32 %v1135_v48 }
 0xb7c   :  { %vm900_vm1 = vmor %vm898_vm15, %vm899_vm14 }
 0xb7d   :  { %v891_v52 = vsel %vm890_vm13, %v1133_v40, %v887_v49  ;;  %v894_v53 = vmul.f32 %v1135_v48, %v893_v50 }
 0xb7e   :  { %v902_v54 = vmul.f32 %v891_v52, %v868_v18 }
 0xb7f   :  { %v895_v55 = vmul.f32 0.5, %v894_v53 }
 0xb80   :  { %v905_v56 = vmul.f32 %v1086_v51, %v902_v54 }
 0xb81   :  { %v896_v57 = vsub.f32 1.5, %v895_v55 }
 0xb82   :  { %v908_v58 = vadd.f32 %v1087_v35, %v905_v56 }
 0xb83   :  { %v897_v59 = vmul.f32 %v1135_v48, %v896_v57 }
 0xb84   :  { %1069 = vmatmul.msk.f32.vlgmr.msra.gmra.mxu0 %vm46_vm0, %v908_v58 }
 0xb85   :  { %v901_v36 = vsel %vm900_vm1, %v1135_v48, %v897_v59 }
 0xb86   :  { %v903_v60 = vmul.f32 %v901_v36, %v869_v24 }
 0xb88   :  { %v906_v61 = vmul.f32 %v1086_v51, %v903_v60 }
 0xb8a   :  { %v909_v62 = vadd.f32 %v1087_v35, %v906_v61 }
 0xb8c   :  { %1070 = vmatmul.msk.f32.gmra.mxu0 %vm46_vm0, %v909_v62 }
 0xc01   :  { %v939_v1 = vpop.f32.mrf.mxu0 }
 0xc02   :  { %v940_v2 = vadd.f32 %v1088_v0, %v939_v1 }
 0xc04   :  { %1071 = vmatmul.msk.f32.vlgmr.msrb.gmra.mxu1 %vm828_vm10, %v940_v2 }
 0xc09   :  { %v942_v3 = vpop.f32.mrf.mxu0 }
 0xc0a   :  { %v943_v5 = vadd.f32 %v1088_v0, %v942_v3 }
 0xc0c   :  { %1072 = vmatmul.msk.f32.gmra.mxu1 %vm828_vm10, %v943_v5 }
 0xc81   :  { %v978_v7 = vpop.f32.mrf.mxu1 }
 0xc82   :  { %v979_v8 = vadd.f32 %v1089_v6, %v978_v7 }
 0xc84   :  { %984 = vst [vmem:[#allocation2] sm:$0xff] %v979_v8 }
 0xc89   :  { %v981_v9 = vpop.f32.mrf.mxu1 }
 0xc8a   :  { %v982_v10 = vadd.f32 %v1089_v6, %v981_v9 }
 0xc8c   :  { %985 = vst [vmem:[#allocation2 + $0x8] sm:$0xff] %v982_v10 }
 0xc8d   :  { %998 = dma.vmem_to_hbm [thread:$0]  %s991_s26, 256, %s993_s28, [#allocation3], %s1164_s29, %s1164_s29, %s1165_s30  }
 0xc8e   :  { %1160 = dma.done.wait [#allocation3], 256  }
 0xc8f   :  { %1161 = vsyncadd [#allocation3], 4294967040 }
 0xc90   :  { %1003 = vsyncpa [#allocation3], 1 }

</bundles_post_ra>
